<compile_context>
chip_gen: v5e
topology: v5e:2x2
jax: 0.10.0
libtpu: 0.0.40
codegen_flags: <defaults>
</compile_context>

<pallas_src>
import math
import functools

import jax
import jax.numpy as jnp
from jax.experimental import pallas as pl
from jax.experimental.pallas import tpu as pltpu


SUBLANE = 8


def _round_up(x, m):
    return (x + m - 1) // m * m


def _num_tensorcores():
    """Best-effort TensorCore count of device 0 (2 on v7x, 1 on v5e/v6e)."""
    try:
        return max(1, int(getattr(jax.devices()[0], "num_cores", 1)))
    except Exception:
        return 1


def _has_bf16_vpu():
    """v6e/v7x have a bf16 VPU; v5e and earlier do not -> keep the f32 epilogue there."""
    try:
        kind = jax.devices()[0].device_kind.lower()
    except Exception:
        return False
    return not any(v in kind for v in ("v2", "v3", "v4", "v5"))


def make_mlp_kernel(n_linear, bf16_epilogue):
    """Fused MLP (Linear -> ReLU -> ... -> Linear) for one batch tile.

    Ref order: x, (w0, b0), (w1, b1), ..., out.
    ReLU after every Linear except the last (matches SimpleNet.net).
    """

    def kernel(*refs):
        x_ref = refs[0]
        o_ref = refs[-1]
        h = x_ref[...].astype(jnp.bfloat16)            # MXU-native lhs
        for i in range(n_linear):
            w = refs[1 + 2 * i][...]                   # bf16 (in, out) -- VMEM-resident
            b = refs[2 + 2 * i][...]                   # f32  (1, out)
            acc = jnp.dot(h, w, preferred_element_type=jnp.float32)
            if i < n_linear - 1:
                if bf16_epilogue:
                    # bf16 bias-add + ReLU: halves VALU work / vreg footprint (v6e/v7x).
                    h = jnp.maximum(acc.astype(jnp.bfloat16) + b.astype(jnp.bfloat16), 0)
                else:
                    # v5e has no bf16 VALU: f32 epilogue, single cast for the next MXU op.
                    h = jnp.maximum(acc + b, 0.0).astype(jnp.bfloat16)
            else:
                # Final layer: narrow (tb, out_dim) f32 store -- no padded writeback.
                o_ref[...] = (acc + b).astype(o_ref.dtype)

    return kernel


def init_simplenet_params(key, num_classes, hidden_layer_config, out_dim):
    """Deterministic init mimicking torch.nn.Linear defaults (uniform +-1/sqrt(fan_in))."""
    dims = [num_classes] + list(hidden_layer_config) + [out_dim]
    params = []
    for i in range(len(dims) - 1):
        fan_in, fan_out = dims[i], dims[i + 1]
        key, kw, kb = jax.random.split(key, 3)
        bound = 1.0 / math.sqrt(fan_in)
        # Stored transposed vs PyTorch: (in_features, out_features).
        w = jax.random.uniform(kw, (fan_in, fan_out), jnp.float32, -bound, bound)
        b = jax.random.uniform(kb, (1, fan_out), jnp.float32, -bound, bound)
        params.append((w, b))
    return params


def prepare_kernel_params(params):
    """Weights -> bf16 (MXU operands); biases stay f32 (cast in-kernel where useful)."""
    flat = []
    for w, b in params:
        flat.append(w.astype(jnp.bfloat16))
        flat.append(b.astype(jnp.float32))
    return tuple(flat)


@functools.partial(jax.jit, static_argnames=("bf16_epilogue", "max_tile", "n_tc"))
def simplenet_forward(x, flat_params, *, bf16_epilogue=False, max_tile=2048, n_tc=1):
    """x: (batch, in_dim) f32. flat_params from prepare_kernel_params.
    Returns (batch, out_dim) f32 (no wrapper-side column slice)."""
    n_linear = len(flat_params) // 2
    batch, in_dim = x.shape
    out_dim = flat_params[-1].shape[-1]

    # Tile selection: VMEM is never binding here; what matters is per-grid-step overhead
    # (~0.35us, grid is a serial loop on one TC) and keeping both TCs busy on v7x.
    if n_tc <= 1 and batch <= max_tile:
        tb = batch                      # single grid step, full-dim block -> no padding
        batch_pad = batch
    else:
        n_tiles = max(n_tc, pl.cdiv(batch, max_tile))
        tb = _round_up(pl.cdiv(batch, n_tiles), SUBLANE)
        batch_pad = _round_up(batch, tb)

    if batch_pad != batch:
        # TODO(synk): a clamped index_map / masked last tile would avoid this HBM
        # round-trip; only reached for ragged batches on the multi-tile path.
        x = jnp.pad(x, ((0, batch_pad - batch), (0, 0)))

    grid = (batch_pad // tb,)
    kernel = make_mlp_kernel(n_linear, bf16_epilogue)

    in_specs = [pl.BlockSpec((tb, in_dim), lambda i: (i, 0))]
    for p in flat_params:
        # Constant index_map -> parameters stay resident in VMEM (no re-DMA per step).
        in_specs.append(pl.BlockSpec(p.shape, lambda i: (0, 0)))
    # Narrow output block: masked vst, but ~64x less HBM writeback than a lane-padded
    # 128-wide block, and no follow-up slice kernel.
    out_specs = pl.BlockSpec((tb, out_dim), lambda i: (i, 0))

    flops = sum(
        2 * batch_pad * flat_params[2 * k].shape[0] * flat_params[2 * k].shape[1]
        for k in range(n_linear))
    bytes_accessed = (
        x.size * x.dtype.itemsize
        + sum(p.size * p.dtype.itemsize for p in flat_params)
        + batch_pad * out_dim * 4)

    out = pl.pallas_call(
        kernel,
        out_shape=jax.ShapeDtypeStruct((batch_pad, out_dim), jnp.float32),
        grid=grid,
        in_specs=in_specs,
        out_specs=out_specs,
        compiler_params=pltpu.CompilerParams(
            dimension_semantics=("parallel",)),  # shards batch grid across TCs on v7x
        cost_estimate=pl.CostEstimate(
            flops=flops, transcendentals=0, bytes_accessed=bytes_accessed),
    )(x, *flat_params)

    return out if batch_pad == batch else out[:batch]


def simplenet_reference(x, params):
    h = x
    n = len(params)
    for i, (w, b) in enumerate(params):
        h = h @ w + b
        if i < n - 1:
            h = jnp.maximum(h, 0.0)
    return h


if __name__ == "__main__":
    # SimpleNet(hidden_layer_config=[64, 32], num_classes=32, w_softmax='no', out_dim=2)
    # w_softmax is unused in forward(), so it has no kernel-side effect.
    num_classes = 32
    hidden_layer_config = [64, 32]
    out_dim = 2

    key = jax.random.PRNGKey(0)
    key, kx, kx2 = jax.random.split(key, 3)

    params = init_simplenet_params(key, num_classes, hidden_layer_config, out_dim)
    flat_params = prepare_kernel_params(params)

    bf16_ep = _has_bf16_vpu()
    n_tc = _num_tensorcores()

    # Small-shape run: single grid step (tb == batch), narrow (batch, 2) output.
    batch = 8
    x = jax.random.normal(kx, (batch, num_classes), jnp.float32)
    out = jax.block_until_ready(
        simplenet_forward(x, flat_params, bf16_epilogue=bf16_ep, n_tc=n_tc))
    ref = simplenet_reference(x, params)
    assert out.shape == (batch, out_dim)
    # bf16 activations/weights on the MXU (f32 accumulate) -> loosened tolerance.
    assert jnp.allclose(out, ref, atol=2e-2, rtol=2e-2), "mismatch (single tile)"

    # Also exercise the multi-tile + ragged-batch path at small shapes by forcing a
    # tiny max_tile (20 rows -> three 8-row tiles, 4 padded rows sliced off).
    batch2 = 20
    x2 = jax.random.normal(kx2, (batch2, num_classes), jnp.float32)
    out2 = jax.block_until_ready(
        simplenet_forward(x2, flat_params, bf16_epilogue=bf16_ep, max_tile=8, n_tc=n_tc))
    ref2 = simplenet_reference(x2, params)
    assert out2.shape == (batch2, out_dim)
    assert jnp.allclose(out2, ref2, atol=2e-2, rtol=2e-2), "mismatch (multi tile)"

    print("KERNEL_OK")
</pallas_src>

<mosaic_0001>
module attributes {stable_mosaic.version = 11 : i64} {
  func.func @kernel(%arg0: i32, %arg1: memref<8x32xf32, #tpu.memory_space<vmem>>, %arg2: memref<32x64xbf16, #tpu.memory_space<vmem>>, %arg3: memref<1x64xf32, #tpu.memory_space<vmem>>, %arg4: memref<64x32xbf16, #tpu.memory_space<vmem>>, %arg5: memref<1x32xf32, #tpu.memory_space<vmem>>, %arg6: memref<32x2xbf16, #tpu.memory_space<vmem>>, %arg7: memref<1x2xf32, #tpu.memory_space<vmem>>, %arg8: memref<8x2xf32, #tpu.memory_space<vmem>>) attributes {dimension_semantics = [#tpu.dimension_semantics<parallel>], iteration_bounds = array<i64: 1>, scalar_prefetch = 0 : i64, scratch_operands = 0 : i64, tpu.core_type = #tpu.core_type<tc>, window_params = [{transform_indices = @transform_0, window_bounds = array<i64: 8, 32>}, {pipeline_mode = #tpu.pipeline_mode<synchronous>, transform_indices = @transform_1, window_bounds = array<i64: 32, 64>}, {pipeline_mode = #tpu.pipeline_mode<synchronous>, transform_indices = @transform_2, window_bounds = array<i64: 1, 64>}, {pipeline_mode = #tpu.pipeline_mode<synchronous>, transform_indices = @transform_3, window_bounds = array<i64: 64, 32>}, {pipeline_mode = #tpu.pipeline_mode<synchronous>, transform_indices = @transform_4, window_bounds = array<i64: 1, 32>}, {pipeline_mode = #tpu.pipeline_mode<synchronous>, transform_indices = @transform_5, window_bounds = array<i64: 32, 2>}, {pipeline_mode = #tpu.pipeline_mode<synchronous>, transform_indices = @transform_6, window_bounds = array<i64: 1, 2>}, {transform_indices = @transform_7, window_bounds = array<i64: 8, 2>}]} {
    %c0 = arith.constant 0 : index
    %c0_0 = arith.constant 0 : index
    %0 = vector.load %arg1[%c0, %c0_0] : memref<8x32xf32, #tpu.memory_space<vmem>>, vector<8x32xf32>
    %1 = arith.truncf %0 : vector<8x32xf32> to vector<8x32xbf16>
    %c0_1 = arith.constant 0 : index
    %c0_2 = arith.constant 0 : index
    %2 = vector.load %arg2[%c0_1, %c0_2] : memref<32x64xbf16, #tpu.memory_space<vmem>>, vector<32x64xbf16>
    %c0_3 = arith.constant 0 : index
    %c0_4 = arith.constant 0 : index
    %3 = vector.load %arg3[%c0_3, %c0_4] : memref<1x64xf32, #tpu.memory_space<vmem>>, vector<1x64xf32>
    %cst = arith.constant dense<0.000000e+00> : vector<8x64xf32>
    %4 = tpu.matmul %1, %2, %cst {dimension_numbers = #tpu.dot_dimension_numbers<[1], [0], [0], [1], [0, 0, 1, 1], [], []>} : vector<8x32xbf16>, vector<32x64xbf16>, vector<8x64xf32> -> vector<8x64xf32>
    %5 = arith.truncf %4 : vector<8x64xf32> to vector<8x64xbf16>
    %6 = arith.truncf %3 : vector<1x64xf32> to vector<1x64xbf16>
    %7 = vector.broadcast %6 : vector<1x64xbf16> to vector<8x64xbf16>
    %8 = arith.addf %5, %7 : vector<8x64xbf16>
    %cst_5 = arith.constant 0.000000e+00 : bf16
    %9 = vector.broadcast %cst_5 : bf16 to vector<8x64xbf16>
    %10 = arith.maximumf %8, %9 : vector<8x64xbf16>
    %c0_6 = arith.constant 0 : index
    %c0_7 = arith.constant 0 : index
    %11 = vector.load %arg4[%c0_6, %c0_7] : memref<64x32xbf16, #tpu.memory_space<vmem>>, vector<64x32xbf16>
    %c0_8 = arith.constant 0 : index
    %c0_9 = arith.constant 0 : index
    %12 = vector.load %arg5[%c0_8, %c0_9] : memref<1x32xf32, #tpu.memory_space<vmem>>, vector<1x32xf32>
    %cst_10 = arith.constant dense<0.000000e+00> : vector<8x32xf32>
    %13 = tpu.matmul %10, %11, %cst_10 {dimension_numbers = #tpu.dot_dimension_numbers<[1], [0], [0], [1], [0, 0, 1, 1], [], []>} : vector<8x64xbf16>, vector<64x32xbf16>, vector<8x32xf32> -> vector<8x32xf32>
    %14 = arith.truncf %13 : vector<8x32xf32> to vector<8x32xbf16>
    %15 = arith.truncf %12 : vector<1x32xf32> to vector<1x32xbf16>
    %16 = vector.broadcast %15 : vector<1x32xbf16> to vector<8x32xbf16>
    %17 = arith.addf %14, %16 : vector<8x32xbf16>
    %cst_11 = arith.constant 0.000000e+00 : bf16
    %18 = vector.broadcast %cst_11 : bf16 to vector<8x32xbf16>
    %19 = arith.maximumf %17, %18 : vector<8x32xbf16>
    %c0_12 = arith.constant 0 : index
    %c0_13 = arith.constant 0 : index
    %20 = vector.load %arg6[%c0_12, %c0_13] : memref<32x2xbf16, #tpu.memory_space<vmem>>, vector<32x2xbf16>
    %c0_14 = arith.constant 0 : index
    %c0_15 = arith.constant 0 : index
    %21 = vector.load %arg7[%c0_14, %c0_15] : memref<1x2xf32, #tpu.memory_space<vmem>>, vector<1x2xf32>
    %cst_16 = arith.constant dense<0.000000e+00> : vector<8x2xf32>
    %22 = tpu.matmul %19, %20, %cst_16 {dimension_numbers = #tpu.dot_dimension_numbers<[1], [0], [0], [1], [0, 0, 1, 1], [], []>} : vector<8x32xbf16>, vector<32x2xbf16>, vector<8x2xf32> -> vector<8x2xf32>
    %23 = vector.broadcast %21 : vector<1x2xf32> to vector<8x2xf32>
    %24 = arith.addf %22, %23 : vector<8x2xf32>
    %c0_17 = arith.constant 0 : index
    %c0_18 = arith.constant 0 : index
    %25 = vector.load %arg8[%c0_17, %c0_18] : memref<8x2xf32, #tpu.memory_space<vmem>>, vector<8x2xf32>
    tpu.vector_store %arg8[%c0_17, %c0_18], %24 {strides = array<i32>} : memref<8x2xf32, #tpu.memory_space<vmem>>, vector<8x2xf32>,
    return
  }
  func.func @transform_0(%arg0: i32) -> (i32, i32) {
    %c0_i32 = arith.constant 0 : i32
    %c0_i32_0 = arith.constant 0 : i32
    return %arg0, %c0_i32 : i32, i32
  }
  func.func @transform_1(%arg0: i32) -> (i32, i32) {
    %c0_i32 = arith.constant 0 : i32
    %c0_i32_0 = arith.constant 0 : i32
    %c0_i32_1 = arith.constant 0 : i32
    return %c0_i32, %c0_i32_0 : i32, i32
  }
  func.func @transform_2(%arg0: i32) -> (i32, i32) {
    %c0_i32 = arith.constant 0 : i32
    %c0_i32_0 = arith.constant 0 : i32
    %c0_i32_1 = arith.constant 0 : i32
    return %c0_i32, %c0_i32_0 : i32, i32
  }
  func.func @transform_3(%arg0: i32) -> (i32, i32) {
    %c0_i32 = arith.constant 0 : i32
    %c0_i32_0 = arith.constant 0 : i32
    %c0_i32_1 = arith.constant 0 : i32
    return %c0_i32, %c0_i32_0 : i32, i32
  }
  func.func @transform_4(%arg0: i32) -> (i32, i32) {
    %c0_i32 = arith.constant 0 : i32
    %c0_i32_0 = arith.constant 0 : i32
    %c0_i32_1 = arith.constant 0 : i32
    return %c0_i32, %c0_i32_0 : i32, i32
  }
  func.func @transform_5(%arg0: i32) -> (i32, i32) {
    %c0_i32 = arith.constant 0 : i32
    %c0_i32_0 = arith.constant 0 : i32
    %c0_i32_1 = arith.constant 0 : i32
    return %c0_i32, %c0_i32_0 : i32, i32
  }
  func.func @transform_6(%arg0: i32) -> (i32, i32) {
    %c0_i32 = arith.constant 0 : i32
    %c0_i32_0 = arith.constant 0 : i32
    %c0_i32_1 = arith.constant 0 : i32
    return %c0_i32, %c0_i32_0 : i32, i32
  }
  func.func @transform_7(%arg0: i32) -> (i32, i32) {
    %c0_i32 = arith.constant 0 : i32
    %c0_i32_0 = arith.constant 0 : i32
    return %arg0, %c0_i32 : i32, i32
  }
}

</mosaic_0001>

<bundles_post_ra>
// kernel: simplenet_forward.1
= control target key start
LH: loop header
LB: loop body
LE: loop exit
PB: predicated region body
PF: predicated region fallthrough
CT: control target
= control target key end

     0   :  { %vm46_vm0 = vcmask 261120   ;;  %vm109_vm1 = vcmask 523264   ;;  %vm175_vm2 = vcmask 15360   ;;  %s306_s1 = inlined_call_operand.vmem [shape: bf16[32,64], index: 1, kind: input, shape index: {}]   ;;  %s307_s0 = inlined_call_operand.vmem [shape: f32[8,32], index: 0, kind: input, shape index: {}]   ;;  %s308_s3 = inlined_call_operand.vmem [shape: bf16[64,32], index: 3, kind: input, shape index: {}]   ;;  %s309_s2 = inlined_call_operand.vmem [shape: f32[1,64], index: 2, kind: input, shape index: {}]   ;;  %s310_s6 = inlined_call_operand.vmem [shape: f32[1,2], index: 6, kind: input, shape index: {}]   ;;  %s311_s5 = inlined_call_operand.vmem [shape: bf16[32,2], index: 5, kind: input, shape index: {}]   ;;  %s312_s4 = inlined_call_operand.vmem [shape: f32[1,32], index: 4, kind: input, shape index: {}]   ;;  %s313_s7 = inlined_call_operand.vmem [shape: f32[8,2], index: 7, kind: output, shape index: {}]  }
   0x1   :  { %v217_v0 = vld [vmem:[%s306_s1 + $0x8] sm:$0xff]  ;;  %v221_v1 = vld [vmem:[%s308_s3 + $0x18] sm:$0xff]  ;;  %v216_v2 = vld [vmem:[%s306_s1] sm:$0xff] }
   0x2   :  { %56 = vmatpush.bf16.msra.mxu0 %v217_v0  ;;  %v27_v3 = vld [vmem:[%s307_s0] sm:$0xff]  ;;  %117 = vmatpush.bf16.msra.mxu1 %v221_v1  ;;  %v220_v5 = vld [vmem:[%s308_s3 + $0x10] sm:$0xff]  ;;  %v219_v6 = vld [vmem:[%s308_s3 + $0x8] sm:$0xff] }
   0x3   :  { %v28_v4 = vpack.c.bf16 %v27_v3, %v27_v3  ;;  %v218_v7 = vld [vmem:[%s308_s3] sm:$0xff]  ;;  %v223_v20 = vld [vmem:[%s311_s5 + $0x8] sm:$0xff] }
   0x4   :  { %v33_v8 = vld [vmem:[%s309_s2] sm:$0x1]  ;;  %168 = vmatpush.bf16.msra.mxu2 %v223_v20 }
   0x5   :  { %v64_v9 = vpack.c.bf16 %v33_v8, %v33_v8  ;;  %v222_v21 = vld [vmem:[%s311_s5] sm:$0xff] }
   0x6   :  { %57 = vmatpush.bf16.msra.mxu0 %v216_v2  ;;  %118 = vmatpush.bf16.msra.mxu1 %v220_v5  ;;  %v84_v22 = vld [vmem:[%s312_s4] sm:$0x1] }
   0x7   :  { %v66_v10 = vpack.i.b16 %v64_v9, %v64_v9  ;;  %v127_v23 = vpack.c.bf16 %v84_v22, %v84_v22  ;;  %v224_v34 = vld [vmem:[%s310_s6] ss:$0 sm:$0xff] }
   0x8   :  { %169 = vmatpush.bf16.msra.mxu2 %v222_v21 }
   0x9   :  { %189 = vmatmul.msk.bf16.vlgmr.msra.gmra.mxu0 %vm46_vm0, %v28_v4  ;;  %v68_v11 = vperm.slane %v66_v10, 0  ;;  %v129_v24 = vpack.i.b16 %v127_v23, %v127_v23 }
   0xa   :  { %119 = vmatpush.bf16.msra.mxu1 %v219_v6 }
   0xb   :  { %v70_v14 = vunpack.c.l.bf16 %v68_v11  ;;  %v131_v25 = vperm.slane %v129_v24, 0 }
   0xd   :  { %v133_v28 = vunpack.c.l.bf16 %v131_v25 }
   0xe   :  { %120 = vmatpush.bf16.msra.mxu1 %v218_v7 }
  0x86   :  { %v59_v12 = vpop.f32.mrf.mxu0 }
  0x87   :  { %v63_v13 = vpack.c.bf16 %v59_v12, %v59_v12 }
  0x89   :  { %v69_v15 = vunpack.c.l.bf16 %v63_v13 }
  0x8b   :  { %v71_v16 = vadd.f32 %v70_v14, %v69_v15 }
  0x8d   :  { %v74_v17 = vmax.f32 %v71_v16, 0.0 }
  0x8e   :  { %v61_v18 = vpop.f32.mrf.mxu0 }
  0x8f   :  { %v75_v19 = vpack.c.bf16 %v74_v17, %v74_v17 }
  0x91   :  { %206 = vmatmul.msk.bf16.vlgmr.msra.gmra.mxu1 %vm109_vm1, %v75_v19 }
 0x10e   :  { %v122_v26 = vpop.f32.mrf.mxu1 }
 0x10f   :  { %v126_v27 = vpack.c.bf16 %v122_v26, %v122_v26 }
 0x111   :  { %v132_v29 = vunpack.c.l.bf16 %v126_v27 }
 0x113   :  { %v134_v30 = vadd.f32 %v133_v28, %v132_v29 }
 0x115   :  { %v137_v31 = vmax.f32 %v134_v30, 0.0 }
 0x116   :  { %v124_v32 = vpop.f32.mrf.mxu1 }
 0x117   :  { %v138_v33 = vpack.c.bf16 %v137_v31, %v137_v31 }
 0x119   :  { %215 = vmatmul.msk.bf16.vlgmr.msra.gmra.mxu2 %vm46_vm0, %v138_v33 }
 0x19c   :  { %v171_v35 = vpop.f32.mrf.mxu2 }
 0x19d   :  { %v172_v36 = vadd.f32 %v224_v34, %v171_v35 }
 0x19f   :  { %176 = vst.msk [vmem:[%s313_s7] sm:$0xff] %vm175_vm2, %v172_v36 }
 0x1a4   :  { %v173_v37 = vpop.f32.mrf.mxu2 }

</bundles_post_ra>
